<compile_context>
chip_gen: v7x
topology: tpu7x:2x2x1
jax: 0.10.0
libtpu: 0.0.40
codegen_flags: <defaults>
</compile_context>

<pallas_src>
import functools

import jax
import jax.numpy as jnp
from jax.experimental import pallas as pl
from jax.experimental.pallas import tpu as pltpu


def _round_up(x, m):
    return (x + m - 1) // m * m


# ---------------------------------------------------------------------------
# Kernel: whole sequence in a single invocation (no grid).
# ---------------------------------------------------------------------------
def rnn_seq_kernel(T,                                            # static (closure via partial)
                   tok_ref,                                      # (TP, 1) int32
                   emb_ref, wih_ref, bih_ref, h0_ref,            # VMEM inputs
                   whh_ref, bhh_ref, wd_ref, bd_ref,
                   logits_ref, hout_ref,                         # VMEM outputs
                   gi_scr, hh_scr):                              # VMEM scratch
    TP, HP = hh_scr.shape
    V = emb_ref.shape[0]

    # --- hoisted, batched input projection for ALL steps (off serial path) --
    lane_ids = jax.lax.broadcasted_iota(jnp.int32, (TP, V), 1)
    onehot = jnp.where(lane_ids == tok_ref[...], 1.0, 0.0).astype(emb_ref.dtype)   # (TP, V)
    x_all = jnp.dot(onehot, emb_ref[...], preferred_element_type=jnp.float32)      # (TP, HP)
    gi_scr[...] = (jnp.dot(x_all.astype(wih_ref.dtype), wih_ref[...],
                           preferred_element_type=jnp.float32)
                   + bih_ref[...])                                                  # (TP, 3*HP)

    if TP > T:
        hh_scr[...] = jnp.zeros_like(hh_scr)    # padded rows -> deterministic logits padding

    whh = whh_ref[...]                          # (HP, 3*HP) bf16, resident in vregs/VMEM
    bhh = bhh_ref[...]                          # (1, 3*HP) f32

    # --- serial recurrence: only the h-dependent matmul + gate math ---------
    def step(t, h):                              # h: (1, HP) f32 carried in-register
        gi = gi_scr[pl.ds(t, 1), :]              # (1, 3*HP) f32, precomputed
        gh = jnp.dot(h.astype(whh.dtype), whh,
                     preferred_element_type=jnp.float32) + bhh     # (1, 3*HP)
        rz = jax.nn.sigmoid(gi[:, 0:2 * HP] + gh[:, 0:2 * HP])     # one EUP stream over [r|z]
        r = rz[:, 0:HP]
        z = rz[:, HP:2 * HP]
        n = jnp.tanh(gi[:, 2 * HP:3 * HP] + r * gh[:, 2 * HP:3 * HP])
        h_new = (1.0 - z) * n + z * h            # PyTorch GRU update (f32)
        hh_scr[pl.ds(t, 1), :] = h_new           # stash for batched decoder
        return h_new

    h_final = jax.lax.fori_loop(0, T, step, h0_ref[...], unroll=True)
    hout_ref[...] = h_final                      # single final-hidden store

    # --- batched decoder: one (TP,HP)@(HP,OP) matmul, one lane-dense store --
    logits_ref[...] = (jnp.dot(hh_scr[...].astype(wd_ref.dtype), wd_ref[...],
                               preferred_element_type=jnp.float32)
                       + bd_ref[...])


# ---------------------------------------------------------------------------
# Parameter packing (PyTorch layout -> lane-aligned layout)
# ---------------------------------------------------------------------------
def pack_params(raw, input_size, hidden_size, output_size, w_dtype=jnp.bfloat16):
    V, H, O = input_size, hidden_size, output_size
    HP = _round_up(H, 128)
    OP = _round_up(O, 128)

    # Embedding table, lane-padded.
    emb_p = jnp.zeros((V, HP), jnp.float32).at[:, :H].set(raw["emb"]).astype(w_dtype)

    # Input / hidden GRU weights, transposed + packed into [r | z | n] HP slabs.
    def pack_w(w):                      # w: (3H, H) PyTorch rows [W_r; W_z; W_n]
        wt = w.T                        # (H, 3H)
        out = jnp.zeros((HP, 3 * HP), jnp.float32)
        for g in range(3):
            out = out.at[:H, g * HP:g * HP + H].set(wt[:, g * H:(g + 1) * H])
        return out.astype(w_dtype)

    def pack_b(b):                      # b: (3H,)
        out = jnp.zeros((1, 3 * HP), jnp.float32)
        for g in range(3):
            out = out.at[0, g * HP:g * HP + H].set(b[g * H:(g + 1) * H])
        return out

    w_ih_p = pack_w(raw["w_ih"])
    w_hh_p = pack_w(raw["w_hh"])
    b_ih_p = pack_b(raw["b_ih"])
    b_hh_p = pack_b(raw["b_hh"])

    # Decoder, transposed + lane-padded.
    w_dec_p = jnp.zeros((HP, OP), jnp.float32).at[:H, :O].set(raw["w_dec"].T).astype(w_dtype)
    b_dec_p = jnp.zeros((1, OP), jnp.float32).at[0, :O].set(raw["b_dec"])

    return {"emb": emb_p,
            "w_ih": w_ih_p, "b_ih": b_ih_p,
            "w_hh": w_hh_p, "b_hh": b_hh_p,
            "w_dec": w_dec_p, "b_dec": b_dec_p,
            "dims": (H, O, HP, OP)}


# ---------------------------------------------------------------------------
# Wrappers
# ---------------------------------------------------------------------------
def rnn_forward_sequence(tokens, hidden, packed):
    """Run T recurrent steps in ONE kernel launch. Returns (logits (T,O), hidden (1,1,H))."""
    H, O, HP, OP = packed["dims"]
    T = int(tokens.shape[0])
    TP = _round_up(T, 8)                 # sublane-aligned row count for batched matmuls

    tok_p = jnp.zeros((TP, 1), jnp.int32).at[:T, 0].set(tokens.astype(jnp.int32))
    h0 = jnp.zeros((1, HP), jnp.float32).at[:, :H].set(
        hidden.reshape(1, H).astype(jnp.float32))

    vmem = pl.BlockSpec(memory_space=pltpu.MemorySpace.VMEM)

    logits_p, h_p = pl.pallas_call(
        functools.partial(rnn_seq_kernel, T),
        out_shape=(jax.ShapeDtypeStruct((TP, OP), jnp.float32),
                   jax.ShapeDtypeStruct((1, HP), jnp.float32)),
        in_specs=[vmem] * 9,
        out_specs=(vmem, vmem),
        scratch_shapes=[
            pltpu.VMEM((TP, 3 * HP), jnp.float32),   # precomputed input projections gi_t
            pltpu.VMEM((TP, HP), jnp.float32),       # per-step hidden states for batched decode
        ],
    )(tok_p, packed["emb"], packed["w_ih"], packed["b_ih"], h0,
      packed["w_hh"], packed["b_hh"], packed["w_dec"], packed["b_dec"])

    logits = logits_p[:T, :O]
    h_new = h_p[:, :H].reshape(1, 1, H)
    return logits, h_new


def rnn_forward(token, hidden, packed):
    """Mirrors RNN.forward(input, hidden): single token, batch=1, n_layers=1."""
    logits, h_new = rnn_forward_sequence(jnp.reshape(token, (-1,)), hidden, packed)
    return logits, h_new     # (1, output_size), (n_layers=1, 1, hidden)


# ---------------------------------------------------------------------------
# Deterministic params (PyTorch-style init) + pure-JAX reference
# ---------------------------------------------------------------------------
def init_raw_params(key, input_size, hidden_size, output_size):
    ks = jax.random.split(key, 7)
    s = 1.0 / jnp.sqrt(jnp.float32(hidden_size))
    u = lambda k, shape: jax.random.uniform(k, shape, jnp.float32, -s, s)
    return {
        "emb":   jax.random.normal(ks[0], (input_size, hidden_size), jnp.float32),
        "w_ih":  u(ks[1], (3 * hidden_size, hidden_size)),   # rows [W_ir; W_iz; W_in]
        "w_hh":  u(ks[2], (3 * hidden_size, hidden_size)),
        "b_ih":  u(ks[3], (3 * hidden_size,)),
        "b_hh":  u(ks[4], (3 * hidden_size,)),
        "w_dec": u(ks[5], (output_size, hidden_size)),
        "b_dec": u(ks[6], (output_size,)),
    }


def rnn_reference(tokens, hidden, raw):
    """Pure-JAX GRU + decoder (PyTorch semantics), mirroring the kernel's bf16 weight casts."""
    q = lambda a: a.astype(jnp.bfloat16).astype(jnp.float32)
    emb, w_ih, w_hh, w_dec = q(raw["emb"]), q(raw["w_ih"]), q(raw["w_hh"]), q(raw["w_dec"])
    b_ih, b_hh, b_dec = raw["b_ih"], raw["b_hh"], raw["b_dec"]
    H = raw["w_hh"].shape[1]
    h = hidden.reshape(1, H).astype(jnp.float32)
    outs = []
    for t in range(int(tokens.shape[0])):
        x = emb[tokens[t]][None, :]
        hq = q(h)                         # kernel feeds bf16 h to the MXU
        gi = x @ w_ih.T + b_ih
        gh = hq @ w_hh.T + b_hh
        i_r, i_z, i_n = gi[:, :H], gi[:, H:2 * H], gi[:, 2 * H:]
        h_r, h_z, h_n = gh[:, :H], gh[:, H:2 * H], gh[:, 2 * H:]
        r = jax.nn.sigmoid(i_r + h_r)
        z = jax.nn.sigmoid(i_z + h_z)
        n = jnp.tanh(i_n + r * h_n)
        h = (1.0 - z) * n + z * h
        outs.append(q(h) @ w_dec.T + b_dec)
    return jnp.concatenate(outs, axis=0), h.reshape(1, 1, H)


if __name__ == "__main__":
    input_size, hidden_size, output_size, n_layers = 64, 32, 64, 1
    seq_len = 8

    key = jax.random.PRNGKey(0)
    kp, kt = jax.random.split(key)
    raw = init_raw_params(kp, input_size, hidden_size, output_size)
    packed = pack_params(raw, input_size, hidden_size, output_size)

    tokens = jax.random.randint(kt, (seq_len,), 0, input_size, dtype=jnp.int32)
    hidden = jnp.zeros((n_layers, 1, hidden_size), jnp.float32)   # init_hidden()

    # Single-step call == RNN.forward(input, hidden)
    out1, h1 = rnn_forward(tokens[:1], hidden, packed)
    # Full sequence fused into one kernel launch
    logits, h_final = rnn_forward_sequence(tokens, hidden, packed)
    jax.block_until_ready((out1, h1, logits, h_final))

    assert out1.shape == (1, output_size)
    assert h1.shape == (n_layers, 1, hidden_size)
    assert logits.shape == (seq_len, output_size)
    assert h_final.shape == (n_layers, 1, hidden_size)

    ref_logits, ref_h = rnn_reference(tokens, hidden, raw)
    assert jnp.allclose(out1, ref_logits[:1], rtol=1e-3, atol=1e-3)
    assert jnp.allclose(logits, ref_logits, rtol=1e-3, atol=1e-3)
    assert jnp.allclose(h_final, ref_h, rtol=1e-3, atol=1e-3)

    # TODO(synk): batch stays 1 to match the module's forward (input.view(1,1,-1));
    # independent streams could be stacked along M (or a "parallel" grid axis) to fill
    # MXU rows and keep both v7x TensorCores busy.
    # TODO(synk): if the vocab grows to thousands of rows, keep the embedding in HBM
    # (BlockSpec(memory_space=pl.ANY)) and gather rows via DMA instead of a resident
    # VMEM table (v7x has only 64 MiB VMEM).
    print("KERNEL_OK")
</pallas_src>

<mosaic_0001>
module attributes {stable_mosaic.version = 11 : i64} {
  func.func @rnn_seq_kernel(%arg0: memref<8x1xi32, #tpu.memory_space<vmem>>, %arg1: memref<64x128xbf16, #tpu.memory_space<vmem>>, %arg2: memref<128x384xbf16, #tpu.memory_space<vmem>>, %arg3: memref<1x384xf32, #tpu.memory_space<vmem>>, %arg4: memref<1x128xf32, #tpu.memory_space<vmem>>, %arg5: memref<128x384xbf16, #tpu.memory_space<vmem>>, %arg6: memref<1x384xf32, #tpu.memory_space<vmem>>, %arg7: memref<128x128xbf16, #tpu.memory_space<vmem>>, %arg8: memref<1x128xf32, #tpu.memory_space<vmem>>, %arg9: memref<8x128xf32, #tpu.memory_space<vmem>>, %arg10: memref<1x128xf32, #tpu.memory_space<vmem>>, %arg11: memref<8x384xf32, #tpu.memory_space<vmem>>, %arg12: memref<8x128xf32, #tpu.memory_space<vmem>>) attributes {dimension_semantics = [], scalar_prefetch = 0 : i64, scratch_operands = 2 : i64, tpu.core_type = #tpu.core_type<tc>} {
    %0 = tpu.iota {dimensions = array<i32: 1>} : vector<8x64xi32>
    %c0 = arith.constant 0 : index
    %c0_0 = arith.constant 0 : index
    %1 = vector.load %arg0[%c0, %c0_0] : memref<8x1xi32, #tpu.memory_space<vmem>>, vector<8x1xi32>
    %2 = vector.broadcast %1 : vector<8x1xi32> to vector<8x64xi32>
    %3 = arith.cmpi eq, %0, %2 : vector<8x64xi32>
    %cst = arith.constant 1.000000e+00 : f32
    %cst_1 = arith.constant 0.000000e+00 : f32
    %4 = vector.broadcast %cst : f32 to vector<8x64xf32>
    %5 = vector.broadcast %cst_1 : f32 to vector<8x64xf32>
    %6 = arith.select %3, %4, %5 : vector<8x64xi1>, vector<8x64xf32>
    %7 = arith.truncf %6 : vector<8x64xf32> to vector<8x64xbf16>
    %c0_2 = arith.constant 0 : index
    %c0_3 = arith.constant 0 : index
    %8 = vector.load %arg1[%c0_2, %c0_3] : memref<64x128xbf16, #tpu.memory_space<vmem>>, vector<64x128xbf16>
    %cst_4 = arith.constant dense<0.000000e+00> : vector<8x128xf32>
    %9 = tpu.matmul %7, %8, %cst_4 {dimension_numbers = #tpu.dot_dimension_numbers<[1], [0], [0], [1], [0, 0, 1, 1], [], []>} : vector<8x64xbf16>, vector<64x128xbf16>, vector<8x128xf32> -> vector<8x128xf32>
    %10 = arith.truncf %9 : vector<8x128xf32> to vector<8x128xbf16>
    %c0_5 = arith.constant 0 : index
    %c0_6 = arith.constant 0 : index
    %11 = vector.load %arg2[%c0_5, %c0_6] : memref<128x384xbf16, #tpu.memory_space<vmem>>, vector<128x384xbf16>
    %cst_7 = arith.constant dense<0.000000e+00> : vector<8x384xf32>
    %12 = tpu.matmul %10, %11, %cst_7 {dimension_numbers = #tpu.dot_dimension_numbers<[1], [0], [0], [1], [0, 0, 1, 1], [], []>} : vector<8x128xbf16>, vector<128x384xbf16>, vector<8x384xf32> -> vector<8x384xf32>
    %c0_8 = arith.constant 0 : index
    %c0_9 = arith.constant 0 : index
    %13 = vector.load %arg3[%c0_8, %c0_9] : memref<1x384xf32, #tpu.memory_space<vmem>>, vector<1x384xf32>
    %14 = vector.broadcast %13 : vector<1x384xf32> to vector<8x384xf32>
    %15 = arith.addf %12, %14 : vector<8x384xf32>
    %c0_10 = arith.constant 0 : index
    %c0_11 = arith.constant 0 : index
    %16 = vector.load %arg11[%c0_10, %c0_11] : memref<8x384xf32, #tpu.memory_space<vmem>>, vector<8x384xf32>
    tpu.vector_store %arg11[%c0_10, %c0_11], %15 {strides = array<i32>} : memref<8x384xf32, #tpu.memory_space<vmem>>, vector<8x384xf32>,
    %cst_12 = arith.constant 0.000000e+00 : f32
    %17 = vector.broadcast %cst_12 : f32 to vector<8x128xf32>
    %c0_13 = arith.constant 0 : index
    %c0_14 = arith.constant 0 : index
    %18 = vector.load %arg12[%c0_13, %c0_14] : memref<8x128xf32, #tpu.memory_space<vmem>>, vector<8x128xf32>
    tpu.vector_store %arg12[%c0_13, %c0_14], %17 {strides = array<i32>} : memref<8x128xf32, #tpu.memory_space<vmem>>, vector<8x128xf32>,
    %c0_15 = arith.constant 0 : index
    %c0_16 = arith.constant 0 : index
    %19 = vector.load %arg5[%c0_15, %c0_16] : memref<128x384xbf16, #tpu.memory_space<vmem>>, vector<128x384xbf16>
    %c0_17 = arith.constant 0 : index
    %c0_18 = arith.constant 0 : index
    %20 = vector.load %arg6[%c0_17, %c0_18] : memref<1x384xf32, #tpu.memory_space<vmem>>, vector<1x384xf32>
    %c0_19 = arith.constant 0 : index
    %c0_20 = arith.constant 0 : index
    %21 = vector.load %arg4[%c0_19, %c0_20] : memref<1x128xf32, #tpu.memory_space<vmem>>, vector<1x128xf32>
    %c0_i32 = arith.constant 0 : i32
    %22 = arith.index_cast %c0_i32 : i32 to index
    %c0_21 = arith.constant 0 : index
    %23 = vector.load %arg11[%22, %c0_21] : memref<8x384xf32, #tpu.memory_space<vmem>>, vector<1x384xf32>
    %24 = arith.truncf %21 : vector<1x128xf32> to vector<1x128xbf16>
    %cst_22 = arith.constant dense<0.000000e+00> : vector<1x384xf32>
    %25 = tpu.matmul %24, %19, %cst_22 {dimension_numbers = #tpu.dot_dimension_numbers<[1], [0], [0], [1], [0, 0, 1, 1], [], []>} : vector<1x128xbf16>, vector<128x384xbf16>, vector<1x384xf32> -> vector<1x384xf32>
    %26 = arith.addf %25, %20 : vector<1x384xf32>
    %27 = vector.extract_strided_slice %23 {offsets = [0, 0], sizes = [1, 256], strides = [1, 1]} : vector<1x384xf32> to vector<1x256xf32>
    %28 = vector.extract_strided_slice %26 {offsets = [0, 0], sizes = [1, 256], strides = [1, 1]} : vector<1x384xf32> to vector<1x256xf32>
    %29 = arith.addf %27, %28 : vector<1x256xf32>
    %30 = arith.negf %29 : vector<1x256xf32>
    %31 = math.exp %30 : vector<1x256xf32>
    %cst_23 = arith.constant 1.000000e+00 : f32
    %32 = vector.broadcast %cst_23 : f32 to vector<1x256xf32>
    %33 = arith.addf %32, %31 : vector<1x256xf32>
    %34 = arith.divf %32, %33 : vector<1x256xf32>
    %35 = vector.extract_strided_slice %34 {offsets = [0, 0], sizes = [1, 128], strides = [1, 1]} : vector<1x256xf32> to vector<1x128xf32>
    %36 = vector.extract_strided_slice %34 {offsets = [0, 128], sizes = [1, 128], strides = [1, 1]} : vector<1x256xf32> to vector<1x128xf32>
    %37 = vector.extract_strided_slice %23 {offsets = [0, 256], sizes = [1, 128], strides = [1, 1]} : vector<1x384xf32> to vector<1x128xf32>
    %38 = vector.extract_strided_slice %26 {offsets = [0, 256], sizes = [1, 128], strides = [1, 1]} : vector<1x384xf32> to vector<1x128xf32>
    %39 = arith.mulf %35, %38 : vector<1x128xf32>
    %40 = arith.addf %37, %39 : vector<1x128xf32>
    %41 = math.tanh %40 : vector<1x128xf32>
    %cst_24 = arith.constant 1.000000e+00 : f32
    %42 = vector.broadcast %cst_24 : f32 to vector<1x128xf32>
    %43 = arith.subf %42, %36 : vector<1x128xf32>
    %44 = arith.mulf %43, %41 : vector<1x128xf32>
    %45 = arith.mulf %36, %21 : vector<1x128xf32>
    %46 = arith.addf %44, %45 : vector<1x128xf32>
    %47 = arith.index_cast %c0_i32 : i32 to index
    %c0_25 = arith.constant 0 : index
    %48 = vector.load %arg12[%47, %c0_25] : memref<8x128xf32, #tpu.memory_space<vmem>>, vector<1x128xf32>
    tpu.vector_store %arg12[%47, %c0_25], %46 {strides = array<i32>} : memref<8x128xf32, #tpu.memory_space<vmem>>, vector<1x128xf32>,
    %c1_i32 = arith.constant 1 : i32
    %c0_26 = arith.constant 0 : index
    %c0_27 = arith.constant 0 : index
    %49 = vector.load %arg10[%c0_26, %c0_27] : memref<1x128xf32, #tpu.memory_space<vmem>>, vector<1x128xf32>
    tpu.vector_store %arg10[%c0_26, %c0_27], %46 {strides = array<i32>} : memref<1x128xf32, #tpu.memory_space<vmem>>, vector<1x128xf32>,
    %c0_28 = arith.constant 0 : index
    %c0_29 = arith.constant 0 : index
    %50 = vector.load %arg12[%c0_28, %c0_29] : memref<8x128xf32, #tpu.memory_space<vmem>>, vector<8x128xf32>
    %51 = arith.truncf %50 : vector<8x128xf32> to vector<8x128xbf16>
    %c0_30 = arith.constant 0 : index
    %c0_31 = arith.constant 0 : index
    %52 = vector.load %arg7[%c0_30, %c0_31] : memref<128x128xbf16, #tpu.memory_space<vmem>>, vector<128x128xbf16>
    %cst_32 = arith.constant dense<0.000000e+00> : vector<8x128xf32>
    %53 = tpu.matmul %51, %52, %cst_32 {dimension_numbers = #tpu.dot_dimension_numbers<[1], [0], [0], [1], [0, 0, 1, 1], [], []>} : vector<8x128xbf16>, vector<128x128xbf16>, vector<8x128xf32> -> vector<8x128xf32>
    %c0_33 = arith.constant 0 : index
    %c0_34 = arith.constant 0 : index
    %54 = vector.load %arg8[%c0_33, %c0_34] : memref<1x128xf32, #tpu.memory_space<vmem>>, vector<1x128xf32>
    %55 = vector.broadcast %54 : vector<1x128xf32> to vector<8x128xf32>
    %56 = arith.addf %53, %55 : vector<8x128xf32>
    %c0_35 = arith.constant 0 : index
    %c0_36 = arith.constant 0 : index
    %57 = vector.load %arg9[%c0_35, %c0_36] : memref<8x128xf32, #tpu.memory_space<vmem>>, vector<8x128xf32>
    tpu.vector_store %arg9[%c0_35, %c0_36], %56 {strides = array<i32>} : memref<8x128xf32, #tpu.memory_space<vmem>>, vector<8x128xf32>,
    return
  }
}

</mosaic_0001>

<bundles_post_ra>
// kernel: tpu_custom_call.1
= control target key start
LH: loop header
LB: loop body
LE: loop exit
PB: predicated region body
PF: predicated region fallthrough
CT: control target
= control target key end

     0   :  { %16 = vsyncpa [#allocation5], 0  ;;  %s1515_s0 = inlined_call_operand.vmem [shape: s32[8,1], index: 0, kind: input, shape index: {}]   ;;  %s1516_s1 = inlined_call_operand.hbm [shape: bf16[64,128], index: 1, kind: input, shape index: {}]   ;;  %s1517_s2 = inlined_call_operand.hbm [shape: bf16[128,384], index: 2, kind: input, shape index: {}]   ;;  %s1518_s3 = inlined_call_operand.vmem [shape: f32[1,384], index: 3, kind: input, shape index: {}]   ;;  %s1519_s4 = inlined_call_operand.vmem [shape: f32[1,128], index: 4, kind: input, shape index: {}]   ;;  %s1520_s5 = inlined_call_operand.hbm [shape: bf16[128,384], index: 5, kind: input, shape index: {}]   ;;  %s1521_s6 = inlined_call_operand.vmem [shape: f32[1,384], index: 6, kind: input, shape index: {}]   ;;  %s1522_s7 = inlined_call_operand.hbm [shape: bf16[128,128], index: 7, kind: input, shape index: {}]   ;;  %s1523_s8 = inlined_call_operand.vmem [shape: f32[1,128], index: 8, kind: input, shape index: {}]   ;;  %s1524_s9 = inlined_call_operand.hbm [shape: f32[8,128], index: 9, kind: output, shape index: {0}]   ;;  %s1525_s10 = inlined_call_operand.hbm [shape: f32[1,128], index: 10, kind: output, shape index: {1}]  }
   0x1   :  { %17 = vsyncpa [#allocation8], 0 }
   0x2   :  { %18 = vsyncpa [#allocation11], 0 }
   0x3   :  { %19 = vsyncpa [#allocation6], 0 }
   0x4   :  { %20 = vsyncpa [#allocation14], 0  ;;  %s1292_s13 = smov [#allocation7]   ;;  %s1150_s17 = scalar_lea.hbm %s1517_s2, 3072 }
   0x5   :  { %s40_s14 = sshll.u32 %s1292_s13, 4  ;;  %p1151_p0 = scmp.ne.s32.totalorder %s1517_s2, %s1150_s17  ;;  %s41_s14 = int_to_ptr.vmem [resolvable:$true] %s40_s14 }
   0x6   :  { %p1154_p1 = scmp.lt.u32.totalorder %s1150_s17, %s1517_s2 }
   0x8   :  { %p1156_p2 = pnand %p1154_p1, %p1151_p0 }
   0xa   :  { %1159 = shalt.err (!%p1156_p2)
}
   0xb   :  { %s1160_s22 = scalar_lea.vmem %s41_s14, 3072  ;;  %p1165_p4 = scmp.lt.s32.totalorder %s41_s14, %s41_s14 }
   0xc   :  { %p1161_p3 = scmp.ne.s32.totalorder %s41_s14, %s1160_s22  ;;  %p1166_p5 = scmp.lt.s32.totalorder %s1160_s22, %s1160_s22 }
   0xe   :  { %p1167_p6 = por %p1166_p5, %p1165_p4 }
  0x10   :  { %p1168_p7 = pnand %p1167_p6, %p1161_p3 }
  0x12   :  { %1171 = shalt.err (!%p1168_p7)
}
  0x13   :  { %s1293_s23 = smov 192   ;;  %s1294_s24 = smov 12  }
  0x14   :  { %46 = dma.hbm_to_vmem [thread:$0]  %s1517_s2, 3072, %s41_s14, [#allocation8], %s1293_s23, %s1293_s23, %s1294_s24  }
  0x15   :  { %s1295_s27 = smov [#allocation4]   ;;  %s1172_s11 = scalar_lea.hbm %s1516_s1, 512 }
  0x16   :  { %s28_s28 = sshll.u32 %s1295_s27, 4  ;;  %p1173_p8 = scmp.ne.s32.totalorder %s1516_s1, %s1172_s11  ;;  %s29_s28 = int_to_ptr.vmem [resolvable:$true] %s28_s28 }
  0x17   :  { %p1176_p9 = scmp.lt.u32.totalorder %s1172_s11, %s1516_s1 }
  0x19   :  { %p1178_p10 = pnand %p1176_p9, %p1173_p8 }
  0x1b   :  { %1181 = shalt.err (!%p1178_p10)
}
  0x1c   :  { %s1182_s17 = scalar_lea.vmem %s29_s28, 512  ;;  %p1187_p12 = scmp.lt.s32.totalorder %s29_s28, %s29_s28 }
  0x1d   :  { %p1183_p11 = scmp.ne.s32.totalorder %s29_s28, %s1182_s17  ;;  %p1188_p13 = scmp.lt.s32.totalorder %s1182_s17, %s1182_s17 }
  0x1f   :  { %p1189_p0 = por %p1188_p13, %p1187_p12 }
  0x21   :  { %p1190_p1 = pnand %p1189_p0, %p1183_p11 }
  0x23   :  { %1193 = shalt.err (!%p1190_p1)
}
  0x24   :  { %s1296_s2 = smov 64   ;;  %s1297_s14 = smov 4  }
  0x25   :  { %34 = dma.hbm_to_vmem [thread:$0]  %s1516_s1, 512, %s29_s28, [#allocation5], %s1296_s2, %s1296_s2, %s1297_s14  }
  0x26   :  { %s1298_s20 = smov [#allocation9]   ;;  %s1299_s22 = smov [#allocation10]  }
  0x27   :  { %s56_s21 = sshll.u32 %s1298_s20, 4  ;;  %s70_s25 = sshll.u32 %s1299_s22, 4  ;;  %s57_s21 = int_to_ptr.vmem [resolvable:$true] %s56_s21  ;;  %s1391_s25 = int_to_ptr.vmem [resolvable:$true] %s70_s25 }
  0x28   :  { %s1194_s29 = scalar_lea.hbm %s1520_s5, 3072 }
  0x29   :  { %p1195_p2 = scmp.ne.s32.totalorder %s1520_s5, %s1194_s29  ;;  %p1198_p3 = scmp.lt.u32.totalorder %s1194_s29, %s1520_s5 }
  0x2b   :  { %p1200_p4 = pnand %p1198_p3, %p1195_p2 }
  0x2d   :  { %1203 = shalt.err (!%p1200_p4)
}
  0x2e   :  { %s1204_s1 = scalar_lea.vmem %s57_s21, 3072  ;;  %p1209_p6 = scmp.lt.s32.totalorder %s57_s21, %s57_s21 }
  0x2f   :  { %p1205_p5 = scmp.ne.s32.totalorder %s57_s21, %s1204_s1  ;;  %p1210_p7 = scmp.lt.s32.totalorder %s1204_s1, %s1204_s1 }
  0x31   :  { %p1211_p8 = por %p1210_p7, %p1209_p6 }
  0x33   :  { %p1212_p9 = pnand %p1211_p8, %p1205_p5 }
  0x35   :  { %1215 = shalt.err (!%p1212_p9)
}
  0x36   :  { %62 = dma.hbm_to_vmem [thread:$0]  %s1520_s5, 3072, %s57_s21, [#allocation8], %s1293_s23, %s1293_s23, %s1294_s24  }
  0x37   :  { %s1216_s18 = scalar_lea.hbm %s1522_s7, 1024 }
  0x38   :  { %p1217_p10 = scmp.ne.s32.totalorder %s1522_s7, %s1216_s18  ;;  %p1220_p11 = scmp.lt.u32.totalorder %s1216_s18, %s1522_s7 }
  0x3a   :  { %p1222_p12 = pnand %p1220_p11, %p1217_p10 }
  0x3c   :  { %1225 = shalt.err (!%p1222_p12)
}
  0x3d   :  { %s1226_s27 = scalar_lea.vmem %s1391_s25, 1024  ;;  %p1231_p0 = scmp.lt.s32.totalorder %s1391_s25, %s1391_s25 }
  0x3e   :  { %p1227_p13 = scmp.ne.s32.totalorder %s1391_s25, %s1226_s27  ;;  %p1232_p1 = scmp.lt.s32.totalorder %s1226_s27, %s1226_s27 }
  0x40   :  { %p1233_p2 = por %p1232_p1, %p1231_p0 }
  0x42   :  { %p1234_p3 = pnand %p1233_p2, %p1227_p13 }
  0x44   :  { %1237 = shalt.err (!%p1234_p3)
}
  0x45   :  { %76 = dma.hbm_to_vmem [thread:$0]  %s1522_s7, 1024, %s1391_s25, [#allocation11], %s1296_s2, %s1296_s2, %s1297_s14  }
  0x46   :  { %1282 = dma.done.wait [#allocation5], 512  }
  0x47   :  { %1283 = vsyncadd [#allocation5], 4294966784 }
  0x48   :  { %1284 = dma.done.wait [#allocation8], 6144  }
  0x49   :  { %1285 = vsyncadd [#allocation8], 4294961152 }
  0x4a   :  { %1286 = dma.done.wait [#allocation11], 1024  }
  0x4b   :  { %1287 = vsyncadd [#allocation11], 4294966272  ;;  %v1300_v0 = vmov 0   ;;  %v1301_v1 = vmov 0.0   ;;  %v94_v2 = vld [vmem:[%s1515_s0] sm:$0xff]  ;;  %v1068_v3 = vld [vmem:[#allocation4] sm:$0xff]   ;;  %v92_v23 = vlaneseq }
  0x4c   :  { %1067 = vset.pattern.permute.xlu0 %v1300_v0  ;;  %981 = vmatprep.subr.bf16.mxu0 %v1301_v1  ;;  %439 = vst [vmem:[#allocation3] sm:$0xff] %v1301_v1  ;;  %v1069_v4 = vld [vmem:[#allocation4 + $0x8] sm:$0xff]   ;;  %vm1302_vm0 = vmmov 0   ;;  %v1072_v5 = vld [vmem:[#allocation7 + $0x4] ss:$12 sps:$4 sm:$0xff]   ;;  %v1071_v10 = vld [vmem:[#allocation4 + $0x18] sm:$0xff]  }
  0x4d   :  { %387 = vmatprep.mubr.bf16.mxu1 %v1300_v0  ;;  %96 = vperm.xlu0 %1067, %v94_v2   ;;  %v1074_v6 = vld [vmem:[#allocation7] ss:$12 sps:$4 sm:$0xff]   ;;  %v1070_v7 = vld [vmem:[#allocation4 + $0x10] sm:$0xff]   ;;  %v1076_v8 = vld [vmem:[#allocation7 + $0x1c] ss:$12 sps:$4 sm:$0xff]   ;;  %v93_v24 = vand.u32 127, %v92_v23 }
  0x4e   :  { %982 = vmatpush3.bf16.msra.mxu0 %v1068_v3  ;;  %989 = vmatprep.mubr.msk.bf16.mxu0 %vm1302_vm0, %v1301_v1  ;;  %v1078_v9 = vld [vmem:[#allocation7 + $0x18] ss:$12 sps:$4 sm:$0xff]   ;;  %v1080_v11 = vld [vmem:[#allocation7 + $0x34] ss:$12 sps:$4 sm:$0xff]   ;;  %v1082_v12 = vld [vmem:[#allocation7 + $0x30] ss:$12 sps:$4 sm:$0xff]  }
  0x4f   :  { %983 = vmatprep.subr.bf16.mxu0 %v1301_v1  ;;  %355 = vmatprep.subr.bf16.mxu1 %v1072_v5  ;;  %v1084_v13 = vld [vmem:[#allocation7 + $0x4c] ss:$12 sps:$4 sm:$0xff]   ;;  %v1086_v14 = vld [vmem:[#allocation7 + $0x48] ss:$12 sps:$4 sm:$0xff]   ;;  %v1088_v15 = vld [vmem:[#allocation7 + $0x64] ss:$12 sps:$4 sm:$0xff]  }
  0x50   :  { %356 = vmatpush1.bf16.msra.mxu1 %v1074_v6  ;;  %v1090_v16 = vld [vmem:[#allocation7 + $0x60] ss:$12 sps:$4 sm:$0xff]   ;;  %v1092_v17 = vld [vmem:[#allocation7 + $0x7c] ss:$12 sps:$4 sm:$0xff]   ;;  %v1094_v18 = vld [vmem:[#allocation7 + $0x78] ss:$12 sps:$4 sm:$0xff]  }
  0x51   :  { %357 = vmatprep.subr.bf16.mxu1 %v1076_v8  ;;  %v1096_v19 = vld [vmem:[#allocation7 + $0x94] ss:$12 sps:$4 sm:$0xff]   ;;  %v1098_v20 = vld [vmem:[#allocation7 + $0x90] ss:$12 sps:$4 sm:$0xff]   ;;  %v1100_v21 = vld [vmem:[#allocation7 + $0xac] ss:$12 sps:$4 sm:$0xff]  }
  0x52   :  { %984 = vmatpush3.bf16.msra.mxu0 %v1069_v4  ;;  %v1102_v22 = vld [vmem:[#allocation7 + $0xa8] ss:$12 sps:$4 sm:$0xff]   ;;  %vm133_vm2 = vcmask 523264   ;;  %v1079_v29 = vld [vmem:[#allocation7 + $0x20] ss:$12 sps:$4 sm:$0xff]  }
  0x53   :  { %985 = vmatprep.subr.bf16.mxu0 %v1301_v1  ;;  %v1075_v27 = vld [vmem:[#allocation7 + $0x8] ss:$12 sps:$4 sm:$0xff]   ;;  %v1083_v30 = vld [vmem:[#allocation7 + $0x38] ss:$12 sps:$4 sm:$0xff]   ;;  %v1087_v31 = vld [vmem:[#allocation7 + $0x50] ss:$12 sps:$4 sm:$0xff]  }
  0x54   :  { %358 = vmatpush1.bf16.msra.mxu1 %v1078_v9  ;;  %v1091_v32 = vld [vmem:[#allocation7 + $0x68] ss:$12 sps:$4 sm:$0xff]   ;;  %v1095_v33 = vld [vmem:[#allocation7 + $0x80] ss:$12 sps:$4 sm:$0xff]   ;;  %v1099_v34 = vld [vmem:[#allocation7 + $0x98] ss:$12 sps:$4 sm:$0xff]  }
  0x55   :  { %359 = vmatprep.subr.bf16.mxu1 %v1080_v11  ;;  %v1103_v35 = vld [vmem:[#allocation7 + $0xb0] ss:$12 sps:$4 sm:$0xff]   ;;  %v1104_v38 = vld [vmem:[#allocation9] ss:$12 sps:$4 sm:$0xff]   ;;  %v1128_v42 = vld [vmem:[#allocation9 + $0x8] ss:$12 sps:$4 sm:$0xff]  }
  0x56   :  { %986 = vmatpush3.bf16.msra.mxu0 %v1070_v7  ;;  %v1106_v36 = vld [vmem:[#allocation9 + $0x4] ss:$12 sps:$4 sm:$0xff]   ;;  %v1109_v41 = vld [vmem:[#allocation9 + $0x1c] ss:$12 sps:$4 sm:$0xff]   ;;  %v1112_v46 = vld [vmem:[#allocation9 + $0x34] ss:$12 sps:$4 sm:$0xff]  }
  0x57   :  { %987 = vmatprep.subr.bf16.mxu0 %v1301_v1  ;;  %v1107_v45 = vld [vmem:[#allocation9 + $0x18] ss:$12 sps:$4 sm:$0xff]   ;;  %v1129_v47 = vld [vmem:[#allocation9 + $0x20] ss:$12 sps:$4 sm:$0xff]   ;;  %v1110_v48 = vld [vmem:[#allocation9 + $0x30] ss:$12 sps:$4 sm:$0xff]  }
  0x58   :  { %360 = vmatpush1.bf16.msra.mxu1 %v1082_v12  ;;  %v1115_v49 = vld [vmem:[#allocation9 + $0x4c] ss:$12 sps:$4 sm:$0xff]   ;;  %v1113_v51 = vld [vmem:[#allocation9 + $0x48] ss:$12 sps:$4 sm:$0xff]   ;;  %v1118_v52 = vld [vmem:[#allocation9 + $0x64] ss:$12 sps:$4 sm:$0xff]  }
  0x59   :  { %361 = vmatprep.subr.bf16.mxu1 %v1084_v13  ;;  %v1130_v50 = vld [vmem:[#allocation9 + $0x38] ss:$12 sps:$4 sm:$0xff]   ;;  %v1131_v53 = vld [vmem:[#allocation9 + $0x50] ss:$12 sps:$4 sm:$0xff]   ;;  %v1116_v54 = vld [vmem:[#allocation9 + $0x60] ss:$12 sps:$4 sm:$0xff]  }
  0x5a   :  { %988 = vmatpush3.bf16.msra.mxu0 %v1071_v10  ;;  %v1121_v55 = vld [vmem:[#allocation9 + $0x7c] ss:$12 sps:$4 sm:$0xff]   ;;  %v1119_v57 = vld [vmem:[#allocation9 + $0x78] ss:$12 sps:$4 sm:$0xff]   ;;  %v1124_v58 = vld [vmem:[#allocation9 + $0x94] ss:$12 sps:$4 sm:$0xff]  }
  0x5b   :  { %993 = vmatprep.subr.bf16.mxu0 %v1301_v1  ;;  %v1132_v56 = vld [vmem:[#allocation9 + $0x68] ss:$12 sps:$4 sm:$0xff]   ;;  %v1133_v59 = vld [vmem:[#allocation9 + $0x80] ss:$12 sps:$4 sm:$0xff]   ;;  %v1122_v60 = vld [vmem:[#allocation9 + $0x90] ss:$12 sps:$4 sm:$0xff]  }
  0x5c   :  { %362 = vmatpush1.bf16.msra.mxu1 %v1086_v14  ;;  %v1127_v61 = vld [vmem:[#allocation9 + $0xac] ss:$12 sps:$4 sm:$0xff]   ;;  %v1125_v63 = vld [vmem:[#allocation9 + $0xa8] ss:$12 sps:$4 sm:$0xff]   ;;  %v1135_v2 = vld [vmem:[#allocation9 + $0xb0] ss:$12 sps:$4 sm:$0xff]  }
  0x5d   :  { %363 = vmatprep.subr.bf16.mxu1 %v1088_v15  ;;  %v1134_v62 = vld [vmem:[#allocation9 + $0x98] ss:$12 sps:$4 sm:$0xff]   ;;  %v1137_v5 = vld [vmem:[#allocation10 + $0x8] sm:$0xff]   ;;  %v1138_v6 = vld [vmem:[#allocation10 + $0x10] sm:$0xff]   ;;  %v213_v12 = vshrl.u32 %v92_v23, 7 }
  0x5e   :  { %v1136_v4 = vld [vmem:[#allocation10] sm:$0xff]   ;;  %v1139_v7 = vld [vmem:[#allocation10 + $0x18] sm:$0xff]   ;;  %v1141_v9 = vld [vmem:[#allocation10 + $0x28] sm:$0xff]  }
  0x5f   :  { %v1140_v8 = vld [vmem:[#allocation10 + $0x20] sm:$0xff]   ;;  %v1142_v10 = vld [vmem:[#allocation10 + $0x30] sm:$0xff]   ;;  %v1143_v11 = vld [vmem:[#allocation10 + $0x38] sm:$0xff]   ;;  %v214_v13 = vsub.s32 0, %v213_v12  ;;  %v222_v14 = vsub.s32 2, %v213_v12 }
  0x60   :  { %364 = vmatpush1.bf16.msra.mxu1 %v1090_v16  ;;  %v210_v15 = vld [vmem:[%s1518_s3] sm:$0x7]  ;;  %v218_v16 = vsub.s32 1, %v213_v12 }
  0x61   :  { %365 = vmatprep.subr.bf16.mxu1 %v1092_v17  ;;  %v215_v17 = vrot.slane %v210_v15, %v214_v13 }
  0x64   :  { %366 = vmatpush1.bf16.msra.mxu1 %v1094_v18  ;;  %v223_v18 = vrot.slane %v210_v15, %v222_v14 }
  0x65   :  { %367 = vmatprep.subr.bf16.mxu1 %v1096_v19  ;;  %v219_v19 = vrot.slane %v210_v15, %v218_v16 }
  0x68   :  { %368 = vmatpush1.bf16.msra.mxu1 %v1098_v20 }
  0x69   :  { %369 = vmatprep.subr.bf16.mxu1 %v1100_v21 }
  0x6c   :  { %370 = vmatpush1.bf16.msra.mxu1 %v1102_v22 }
  0x6d   :  { %620 = vmatprep.subr.bf16.mxu1 %v1106_v36 }
  0xcc   :  { %v97_v25 = vpop.permute.xlu0 %96 }
  0xcd   :  { %vm98_vm1 = vcmp.eq.s32.totalorder %v93_v24, %v97_v25 }
  0xce   :  { %v99_v26 = vsel %vm98_vm1, 1.0, %v1301_v1 }
  0xcf   :  { %v100_v28 = vpack.c.bf16 %v99_v26, %v99_v26 }
  0xd1   :  { %990 = vmatmul.mubr.msk.bf16.vlgmr.msra.gmra.mrb[0].mxu0 %vm133_vm2, %v100_v28 }
  0xd2   :  { %994 = vmatpush3.bf16.msra.mxu0 %v1075_v27  ;;  %1009 = vmatprep.mubr.msk.bf16.mxu0 %vm1302_vm0, %v1301_v1 }
  0xd3   :  { %995 = vmatprep.subr.bf16.mxu0 %v1301_v1 }
  0xd6   :  { %996 = vmatpush3.bf16.msra.mxu0 %v1079_v29 }
  0xd7   :  { %997 = vmatprep.subr.bf16.mxu0 %v1301_v1 }
  0xda   :  { %998 = vmatpush3.bf16.msra.mxu0 %v1083_v30  ;;  %v472_v30 = vld [vmem:[%s1521_s6] sm:$0x7]  ;;  %s1304_s6 = smov [#allocation13]  }
  0xdb   :  { %999 = vmatprep.subr.bf16.mxu0 %v1301_v1  ;;  %v616_v36 = vrot.slane %v472_v30, %v222_v14  ;;  %s871_s25 = sshll.u32 %s1304_s6, 4  ;;  %s872_s25 = int_to_ptr.vmem [resolvable:$true] %s871_s25 }
  0xdc   :  { %s1238_s29 = scalar_lea.vmem %s872_s25, 16  ;;  %s1242_s30 = scalar_lea.vmem %s872_s25, 32 }
  0xdd   :  { %p1239_p4 = scmp.ne.s32.totalorder %s872_s25, %s1238_s29  ;;  %p1243_p5 = scmp.lt.s32.totalorder %s872_s25, %s872_s25 }
  0xde   :  { %1000 = vmatpush3.bf16.msra.mxu0 %v1087_v31  ;;  %v1303_v31 = vmov 1966171168   ;;  %p1244_p6 = scmp.lt.s32.totalorder %s1242_s30, %s1238_s29 }
  0xdf   :  { %1001 = vmatprep.subr.bf16.mxu0 %v1301_v1 }
  0xe0   :  { %p1245_p7 = por %p1244_p6, %p1243_p5 }
  0xe2   :  { %1002 = vmatpush3.bf16.msra.mxu0 %v1091_v32  ;;  %v705_v32 = vunpack.c.l.s4 %v1303_v31  ;;  %p1246_p8 = pnand %p1245_p7, %p1239_p4 }
  0xe3   :  { %1003 = vmatprep.subr.bf16.mxu0 %v1301_v1 }
  0xe6   :  { %1004 = vmatpush3.bf16.msra.mxu0 %v1095_v33  ;;  %v608_v33 = vrot.slane %v472_v30, %v214_v13 }
  0xe7   :  { %1005 = vmatprep.subr.bf16.mxu0 %v1301_v1 }
  0xea   :  { %1006 = vmatpush3.bf16.msra.mxu0 %v1099_v34  ;;  %v612_v34 = vrot.slane %v472_v30, %v218_v16 }
  0xeb   :  { %1007 = vmatprep.subr.bf16.mxu0 %v1301_v1 }
  0xee   :  { %1008 = vmatpush3.bf16.msra.mxu0 %v1103_v35  ;;  %v706_v35 = vunpack.c.0.s8 %v705_v32 }
  0xef   :  { %1013 = vmatprep.subr.bf16.mxu0 %v1301_v1 }
 0x1a4   :  { %v171_v37 = vpop.f32.mrb[0].mxu0 }
 0x1a5   :  { %v177_v39 = vpack.c.bf16 %v171_v37, %v171_v37  ;;  %v991_v40 = vpop.f32.mrb[1].mxu0 }
 0x1a6   :  { %v174_v43 = vpop.f32.mrb[2].mxu0 }
 0x1a7   :  { %v992_v44 = vpop.f32.mrb[3].mxu0  ;;  %388 = vmatmul.mubr.bf16.vlgmr.msra.gmra.mrb[0].mxu1 %v177_v39  ;;  %1010 = vmatmul.mubr.bf16.vlgmr.msra.gmra.mrb[4].mxu0 %v177_v39 }
 0x1a8   :  { %621 = vmatpush1.bf16.msra.mxu1 %v1104_v38  ;;  %652 = vmatprep.mubr.bf16.mxu1 %v1300_v0  ;;  %v1465_v0 = vld [vmem:[%s1519_s4] sm:$0x1] }
 0x1a9   :  { %622 = vmatprep.subr.bf16.mxu1 %v1109_v41  ;;  %1014 = vmatpush3.bf16.msra.mxu0 %v1128_v42  ;;  %v475_v3 = vpack.c.bf16 %v1465_v0, %v1465_v0  ;;  %v709_v42 = vsub.s32 %v706_v35, %v213_v12 }
 0x1aa   :  { %1015 = vmatprep.subr.bf16.mxu0 %v1301_v1  ;;  %1029 = vmatprep.mubr.msk.bf16.mxu0 %vm1302_vm0, %v1301_v1 }
 0x1ac   :  { %623 = vmatpush1.bf16.msra.mxu1 %v1107_v45 }
 0x1ad   :  { %624 = vmatprep.subr.bf16.mxu1 %v1112_v46  ;;  %1016 = vmatpush3.bf16.msra.mxu0 %v1129_v47 }
 0x1ae   :  { %1017 = vmatprep.subr.bf16.mxu0 %v1301_v1 }
 0x1b0   :  { %625 = vmatpush1.bf16.msra.mxu1 %v1110_v48 }
 0x1b1   :  { %626 = vmatprep.subr.bf16.mxu1 %v1115_v49  ;;  %1018 = vmatpush3.bf16.msra.mxu0 %v1130_v50 }
 0x1b2   :  { %1019 = vmatprep.subr.bf16.mxu0 %v1301_v1 }
 0x1b4   :  { %627 = vmatpush1.bf16.msra.mxu1 %v1113_v51 }
 0x1b5   :  { %628 = vmatprep.subr.bf16.mxu1 %v1118_v52  ;;  %1020 = vmatpush3.bf16.msra.mxu0 %v1131_v53 }
 0x1b6   :  { %1021 = vmatprep.subr.bf16.mxu0 %v1301_v1 }
 0x1b8   :  { %629 = vmatpush1.bf16.msra.mxu1 %v1116_v54 }
 0x1b9   :  { %630 = vmatprep.subr.bf16.mxu1 %v1121_v55  ;;  %1022 = vmatpush3.bf16.msra.mxu0 %v1132_v56 }
 0x1ba   :  { %1023 = vmatprep.subr.bf16.mxu0 %v1301_v1 }
 0x1bc   :  { %631 = vmatpush1.bf16.msra.mxu1 %v1119_v57 }
 0x1bd   :  { %632 = vmatprep.subr.bf16.mxu1 %v1124_v58  ;;  %1024 = vmatpush3.bf16.msra.mxu0 %v1133_v59 }
 0x1be   :  { %1025 = vmatprep.subr.bf16.mxu0 %v1301_v1 }
 0x1c0   :  { %633 = vmatpush1.bf16.msra.mxu1 %v1122_v60 }
 0x1c1   :  { %634 = vmatprep.subr.bf16.mxu1 %v1127_v61  ;;  %1026 = vmatpush3.bf16.msra.mxu0 %v1134_v62 }
 0x1c2   :  { %1027 = vmatprep.subr.bf16.mxu0 %v1301_v1 }
 0x1c4   :  { %635 = vmatpush1.bf16.msra.mxu1 %v1125_v63 }
 0x1c5   :  { %1028 = vmatpush3.bf16.msra.mxu0 %v1135_v2  ;;  %1033 = vmatprep.subr.bf16.mxu1 %v1301_v1 }
 0x1c7   :  { %653 = vmatmul.mubr.bf16.vlgmr.msra.gmra.mrb[4].mxu1 %v475_v3 }
 0x1c8   :  { %1030 = vmatmul.mubr.bf16.vlgmr.msra.gmra.mrb[8].mxu0 %v475_v3  ;;  %1049 = vmatprep.mubr.msk.bf16.mxu1 %vm1302_vm0, %v1301_v1 }
 0x1c9   :  { %1034 = vmatpush3.bf16.msra.mxu1 %v1136_v4 }
 0x1ca   :  { %1035 = vmatprep.subr.bf16.mxu1 %v1301_v1 }
 0x1cd   :  { %1036 = vmatpush3.bf16.msra.mxu1 %v1137_v5 }
 0x1ce   :  { %1037 = vmatprep.subr.bf16.mxu1 %v1301_v1 }
 0x1d1   :  { %1038 = vmatpush3.bf16.msra.mxu1 %v1138_v6 }
 0x1d2   :  { %1039 = vmatprep.subr.bf16.mxu1 %v1301_v1 }
 0x1d5   :  { %1040 = vmatpush3.bf16.msra.mxu1 %v1139_v7 }
 0x1d6   :  { %1041 = vmatprep.subr.bf16.mxu1 %v1301_v1 }
 0x1d9   :  { %1042 = vmatpush3.bf16.msra.mxu1 %v1140_v8 }
 0x1da   :  { %1043 = vmatprep.subr.bf16.mxu1 %v1301_v1 }
 0x1dd   :  { %1044 = vmatpush3.bf16.msra.mxu1 %v1141_v9 }
 0x1de   :  { %1045 = vmatprep.subr.bf16.mxu1 %v1301_v1 }
 0x1e1   :  { %1046 = vmatpush3.bf16.msra.mxu1 %v1142_v10 }
 0x1e2   :  { %1047 = vmatprep.subr.bf16.mxu1 %v1301_v1 }
 0x1e5   :  { %1048 = vmatpush3.bf16.msra.mxu1 %v1143_v11 }
 0x27a   :  { %v389_v20 = vpop.f32.mrb[0].mxu1  ;;  %v430_v21 = vpop.f32.mrb[4].mxu0 }
 0x27b   :  { %v390_v22 = vadd.f32 %v389_v20, %v215_v17  ;;  %v431_v24 = vadd.f32 %v430_v21, %v223_v18  ;;  %v391_v25 = vpop.f32.mrb[1].mxu1  ;;  %v1011_v26 = vpop.f32.mrb[5].mxu0 }
 0x27c   :  { %v392_v1 = vadd.f32 %v391_v25, %v219_v19  ;;  %v393_v27 = vpop.f32.mrb[2].mxu1  ;;  %v433_v28 = vpop.f32.mrb[6].mxu0 }
 0x27d   :  { %436 = vst [vmem:[#allocation2] sm:$0xff] %v390_v22  ;;  %438 = vst [vmem:[#allocation2 + $0x10] sm:$0xff] %v431_v24  ;;  %v394_v23 = vpop.f32.mrb[3].mxu1  ;;  %v1012_v29 = vpop.f32.mrb[7].mxu0 }
 0x27e   :  { %437 = vst [vmem:[#allocation2 + $0x8] sm:$0xff] %v392_v1 }
 0x285   :  { %v474_v52 = vld [vmem:[#allocation2] ss:$8 sm:$0x7] }
 0x286   :  { %v728_v59 = vrot.slane %v474_v52, 2 }
 0x29a   :  { %v654_v37 = vpop.f32.mrb[4].mxu1 }
 0x29b   :  { %v655_v38 = vadd.f32 %v654_v37, %v608_v33  ;;  %v656_v39 = vpop.f32.mrb[5].mxu1  ;;  %v695_v40 = vpop.f32.mrb[8].mxu0 }
 0x29c   :  { %v657_v41 = vadd.f32 %v656_v39, %v612_v34  ;;  %v658_v43 = vpop.f32.mrb[6].mxu1  ;;  %v696_v44 = vadd.f32 %v695_v40, %v616_v36  ;;  %v1031_v45 = vpop.f32.mrb[9].mxu0 }
 0x29d   :  { %v659_v46 = vpop.f32.mrb[7].mxu1  ;;  %v698_v47 = vpop.f32.mrb[10].mxu0 }
 0x29e   :  { %v703_v48 = vcombine.low %v655_v38, %v657_v41  ;;  %v1032_v49 = vpop.f32.mrb[11].mxu0 }
 0x2a0   :  { %v710_v50 = vrot.slane %v703_v48, %v709_v42 }
 0x2a2   :  { %v717_v51 = vrot.slane %v710_v50, %v709_v42 }
 0x2a4   :  { %v719_v53 = vadd.f32 %v717_v51, %v474_v52 }
 0x2a6   :  { %v939_v54 = vmul.f32 -1.442695, %v719_v53 }
 0x2a8   :  { %1144 = vpow2.f32 %v939_v54 }
 0x2b2   :  { %v1145_v55 = vpop.eup %1144 }
 0x2b3   :  { %v723_v56 = vadd.f32 1.0, %v1145_v55 }
 0x2b5   :  { %1146 = vrcp.f32 %v723_v56 }
 0x2bf   :  { %v1147_v57 = vpop.eup %1146 }
 0x2c0   :  { %v726_v58 = vmul.f32 %v1147_v57, %v696_v44  ;;  %v733_v61 = vrot.slane %v1147_v57, 1 }
 0x2c2   :  { %v730_v60 = vadd.f32 %v728_v59, %v726_v58  ;;  %v735_v62 = vsub.f32 1.0, %v733_v61  ;;  %v737_v3 = vmul.f32 %v733_v61, %v1465_v0 }
 0x2c4   :  { %1148 = vtanh.f32 %v730_v60 }
 0x2ce   :  { %v1149_v63 = vpop.eup %1148 }
 0x2cf   :  { %v736_v2 = vmul.f32 %v1149_v63, %v735_v62 }
 0x2d1   :  { %v738_v4 = vadd.f32 %v737_v3, %v736_v2 }
 0x2d3   :  { %739 = vst [vmem:[#allocation3] sm:$0x1] %v738_v4  ;;  %740 = vst [vmem:[#allocation13] sm:$0x1] %v738_v4 }
 0x2da   :  { %v741_v5 = vld [vmem:[#allocation3] sm:$0xff] }
 0x2db   :  { %v742_v6 = vpack.c.bf16 %v741_v5, %v741_v5 }
 0x2dd   :  { %1050 = vmatmul.mubr.bf16.vlgmr.msra.gmra.mrb[8].mxu1 %v742_v6 }
 0x2de   :  { %1249 = shalt.err (!%p1246_p8)
}
 0x2df   :  { %s1250_s13 = scalar_lea.hbm %s1525_s10, 16 }
 0x2e0   :  { %p1251_p9 = scmp.ne.s32.totalorder %s1525_s10, %s1250_s13  ;;  %p1254_p10 = scmp.lt.u32.totalorder %s1250_s13, %s1525_s10 }
 0x2e2   :  { %p1256_p11 = pnand %p1254_p10, %p1251_p9 }
 0x2e4   :  { %1259 = shalt.err (!%p1256_p11)
}
 0x2e5   :  { %874 = dma.vmem_to_hbm [thread:$0]  %s872_s25, 16, %s1525_s10, [#allocation14]   ;;  %v940_v0 = vld [vmem:[%s1523_s8] ss:$0 sm:$0xff] }
 0x2e6   :  { %s1305_s22 = smov [#allocation12]  }
 0x2e7   :  { %s861_s26 = sshll.u32 %s1305_s22, 4  ;;  %s862_s26 = int_to_ptr.vmem [resolvable:$true] %s861_s26 }
 0x2e8   :  { %s1260_s27 = scalar_lea.vmem %s862_s26, 128  ;;  %p1265_p13 = scmp.lt.s32.totalorder %s862_s26, %s862_s26 }
 0x2e9   :  { %p1261_p12 = scmp.ne.s32.totalorder %s862_s26, %s1260_s27  ;;  %p1266_p0 = scmp.lt.s32.totalorder %s1260_s27, %s1260_s27 }
 0x2eb   :  { %p1267_p1 = por %p1266_p0, %p1265_p13 }
 0x2ed   :  { %p1268_p2 = pnand %p1267_p1, %p1261_p12 }
 0x3b0   :  { %v848_v7 = vpop.f32.mrb[8].mxu1 }
 0x3b1   :  { %v849_v8 = vadd.f32 %v940_v0, %v848_v7  ;;  %v1051_v9 = vpop.f32.mrb[9].mxu1 }
 0x3b2   :  { %v851_v10 = vpop.f32.mrb[10].mxu1 }
 0x3b3   :  { %854 = vst [vmem:[#allocation12] sm:$0xff] %v849_v8  ;;  %v1052_v11 = vpop.f32.mrb[11].mxu1 }
 0x3b4   :  { %1271 = shalt.err (!%p1268_p2)
}
 0x3b5   :  { %s1272_s8 = scalar_lea.hbm %s1524_s9, 128 }
 0x3b6   :  { %p1273_p3 = scmp.ne.s32.totalorder %s1524_s9, %s1272_s8  ;;  %p1276_p4 = scmp.lt.u32.totalorder %s1272_s8, %s1524_s9 }
 0x3b8   :  { %p1278_p5 = pnand %p1276_p4, %p1273_p3 }
 0x3ba   :  { %1281 = shalt.err (!%p1278_p5)
}
 0x3bb   :  { %864 = dma.vmem_to_hbm [thread:$0]  %s862_s26, 128, %s1524_s9, [#allocation6]  }
 0x3bc   :  { %1288 = dma.done.wait [#allocation6], 128  }
 0x3bd   :  { %1289 = vsyncadd [#allocation6], 4294967168 }
 0x3be   :  { %1290 = dma.done.wait [#allocation14], 16  }
 0x3bf   :  { %1291 = vsyncadd [#allocation14], 4294967280 }
 0x3c0   :  { %881 = vsyncpa [#allocation5], 1 }
 0x3c1   :  { %882 = vsyncpa [#allocation8], 1 }
 0x3c2   :  { %883 = vsyncpa [#allocation11], 1 }
 0x3c3   :  { %884 = vsyncpa [#allocation6], 1 }
 0x3c4   :  { %885 = vsyncpa [#allocation14], 1 }

</bundles_post_ra>
